<compile_context>
chip_gen: v7x
topology: tpu7x:2x2x1
jax: 0.10.0
libtpu: 0.0.40
codegen_flags: <defaults>
</compile_context>

<pallas_src>
import math
from functools import partial

import jax
import jax.numpy as jnp
from jax.experimental import pallas as pl
from jax.experimental.pallas import tpu as pltpu  # noqa: F401  (kept for TPU-specific tuning hooks)


def _versa_kernel(qf_ref, wm_ref, wlv_ref, bm_ref, blv_ref, tgt_ref, eps_ref,
                  avg_ref, score_ref):
    """Whole-problem kernel: fused matmuls, sampling, CE log-softmax, both logsumexps."""
    qf = qf_ref[...]            # (E, Q, D)
    wm = wm_ref[...]            # (E, D, W)
    wlv = wlv_ref[...]          # (E, D, W)
    bm = bm_ref[...]            # (E, 1, W)
    blv = blv_ref[...]          # (E, 1, W)
    tgt = tgt_ref[...]          # (E, Q, 1) int32
    eps = eps_ref[...]          # (S, E, Q, W)

    E, Q, _ = qf.shape
    W = wm.shape[-1]
    S = eps.shape[0]
    log_S = math.log(S)

    # --- One fused MXU push carries both linear forms ---------------------------
    #   mu_raw  = qf   @ wm        -> rows [0:Q),  cols [0:W)
    #   var_raw = qf^2 @ exp(wlv)  -> rows [Q:2Q), cols [W:2W)
    lhs = jnp.concatenate([qf, qf * qf], axis=1)                     # (E, 2Q, D)
    rhs = jnp.concatenate([wm, jnp.exp(wlv)], axis=2)                # (E, D, 2W)
    prod = jnp.einsum('eqd,edw->eqw', lhs, rhs,
                      preferred_element_type=jnp.float32)            # (E, 2Q, 2W)
    mu = prod[:, :Q, :W] + bm                                        # (E, Q, W)
    var_lin = prod[:, Q:, W:] + jnp.exp(blv)                         # (E, Q, W)

    # sample_normal: mu + eps * sqrt(exp(log(var))) == mu + eps * sqrt(var)
    logits = mu[None] + eps * jnp.sqrt(var_lin)[None]                # (S, E, Q, W)

    # --- Shared per-(e,q) max over samples AND classes -> single exp pass -------
    m = jnp.max(jnp.max(logits, axis=3, keepdims=True), axis=0, keepdims=True)  # (1,E,Q,1)
    ex = jnp.exp(logits - m)                                         # (S, E, Q, W)

    # averaged_prediction = logsumexp over samples - log(S)
    avg_ref[...] = (jnp.log(jnp.sum(ex, axis=0)) + m[0] - log_S).astype(avg_ref.dtype)

    # loss[s,e,q] = log_softmax(logits)[label] == -CrossEntropyLoss(reduction='none')
    classes = jax.lax.broadcasted_iota(jnp.int32, (E, Q, W), 2)
    onehot = (tgt == classes).astype(jnp.float32)                    # (E, Q, W)
    picked = jnp.sum(logits * onehot[None], axis=3, keepdims=True)   # (S, E, Q, 1)
    lse_w = jnp.log(jnp.sum(ex, axis=3, keepdims=True)) + m          # (S, E, Q, 1)
    loss = picked - lse_w                                            # (S, E, Q, 1)

    # --- Reference scramble, reproduced exactly, folded into the kernel ---------
    # The PyTorch module views the (s,e,q)-ordered flat loss as (E, S, Q), permutes to
    # (S, E, Q) and logsumexps over dim 0.  Output group a, slot b therefore pulls the
    # natural-order element n = a*S + b  ->  (s, e) = (n // E, n % E).  E and S are
    # trace-time constants, so this is a static, purely elementwise regrouping
    # (no in-kernel reshape/relayout of the minor dims needed).
    for a in range(E):
        slabs = [loss[(a * S + b) // E, (a * S + b) % E] for b in range(S)]   # each (Q, 1)
        gmax = slabs[0]
        for t in slabs[1:]:
            gmax = jnp.maximum(gmax, t)
        ssum = jnp.zeros_like(gmax)
        for t in slabs:
            ssum = ssum + jnp.exp(t - gmax)
        score_ref[a] = (jnp.log(ssum) + gmax - log_S).astype(score_ref.dtype)  # (Q, 1)


@partial(jax.jit, static_argnums=(0, 1))
def versa_layer_forward(way_num, sample_num, query_feat, query_target,
                        weight_mean, weight_logvar, bias_mean, bias_logvar, eps):
    E, Q, _ = query_feat.shape
    W = way_num
    del sample_num  # S is carried by eps.shape[0]
    tgt = query_target.reshape(E, Q, 1).astype(jnp.int32)

    # Single invocation, no grid: every operand/result is a whole-array VMEM block
    # (working set ~6 KB -- far under VMEM on v5e/v6e/v7x).  No megacore sharding.
    avg, score = pl.pallas_call(
        _versa_kernel,
        out_shape=(jax.ShapeDtypeStruct((E, Q, W), jnp.float32),
                   jax.ShapeDtypeStruct((E, Q, 1), jnp.float32)),
    )(query_feat, weight_mean, weight_logvar, bias_mean, bias_logvar, tgt, eps)

    # Row-major reshapes only (free bitcasts under jit).
    return avg.reshape(E * Q, W), score.reshape(E * Q)


def versa_layer_reference(way_num, sample_num, query_feat, query_target,
                          weight_mean, weight_logvar, bias_mean, bias_logvar, eps):
    """Pure-JAX mirror of the PyTorch forward (same eps), used only for validation."""
    E = query_feat.shape[0]
    hp = jax.lax.Precision.HIGHEST
    tgt = query_target.reshape(-1)
    logits_mean = jnp.matmul(query_feat, weight_mean, precision=hp) + bias_mean
    logits_logvar = jnp.log(
        jnp.matmul(query_feat ** 2, jnp.exp(weight_logvar), precision=hp) + jnp.exp(bias_logvar))
    samples = logits_mean[None] + eps * jnp.sqrt(jnp.exp(logits_logvar))[None]   # (S, E, Q, W)
    logits_flat = samples.reshape(-1, way_num)
    labels = jnp.tile(tgt, sample_num)
    logp = jax.nn.log_softmax(logits_flat, axis=-1)
    loss = jnp.take_along_axis(logp, labels[:, None], axis=-1)[:, 0]
    loss = loss.reshape(E, sample_num, -1).transpose(1, 0, 2).reshape(sample_num, -1)
    task_score = jax.scipy.special.logsumexp(loss, axis=0) - jnp.log(float(sample_num))
    sq = logits_flat.reshape(sample_num, -1, way_num)
    avg_pred = jax.scipy.special.logsumexp(sq, axis=0) - jnp.log(float(sample_num))
    return avg_pred, task_score


if __name__ == "__main__":
    E, Q, D, W, S = 2, 8, 32, 4, 5   # episodes, queries/episode, feat dim, way_num, sample_num

    key = jax.random.PRNGKey(0)
    k1, k2, k3, k4, k5, k6, k7 = jax.random.split(key, 7)
    query_feat = jax.random.normal(k1, (E, Q, D), dtype=jnp.float32)
    weight_mean = jax.random.normal(k2, (E, D, W), dtype=jnp.float32) * 0.1
    weight_logvar = jax.random.normal(k3, (E, D, W), dtype=jnp.float32) * 0.1 - 2.0
    bias_mean = jax.random.normal(k4, (E, 1, W), dtype=jnp.float32) * 0.1
    bias_logvar = jax.random.normal(k5, (E, 1, W), dtype=jnp.float32) * 0.1 - 2.0
    query_target = jax.random.randint(k6, (E, Q), 0, W, dtype=jnp.int32)
    # TODO(synk): torch.randn inside sample_normal is hoisted to a pre-sampled eps input
    # so the kernel stays deterministic and checkable against the reference.
    eps = jax.random.normal(k7, (S, E, Q, W), dtype=jnp.float32)

    avg_pred, task_score = versa_layer_forward(
        W, S, query_feat, query_target,
        weight_mean, weight_logvar, bias_mean, bias_logvar, eps)
    jax.block_until_ready((avg_pred, task_score))

    ref_avg, ref_score = versa_layer_reference(
        W, S, query_feat, query_target,
        weight_mean, weight_logvar, bias_mean, bias_logvar, eps)

    assert avg_pred.shape == (E * Q, W) and task_score.shape == (E * Q,)
    assert jnp.allclose(avg_pred, ref_avg, rtol=1e-3, atol=1e-3)
    assert jnp.allclose(task_score, ref_score, rtol=1e-3, atol=1e-3)

    print("KERNEL_OK")
</pallas_src>

<mosaic_0001>
module attributes {stable_mosaic.version = 11 : i64} {
  func.func @_versa_kernel(%arg0: memref<2x8x32xf32, #tpu.memory_space<vmem>>, %arg1: memref<2x32x4xf32, #tpu.memory_space<vmem>>, %arg2: memref<2x32x4xf32, #tpu.memory_space<vmem>>, %arg3: memref<2x1x4xf32, #tpu.memory_space<vmem>>, %arg4: memref<2x1x4xf32, #tpu.memory_space<vmem>>, %arg5: memref<2x8x1xi32, #tpu.memory_space<vmem>>, %arg6: memref<5x2x8x4xf32, #tpu.memory_space<vmem>>, %arg7: memref<2x8x4xf32, #tpu.memory_space<vmem>>, %arg8: memref<2x8x1xf32, #tpu.memory_space<vmem>>) attributes {dimension_semantics = [], scalar_prefetch = 0 : i64, scratch_operands = 0 : i64, tpu.core_type = #tpu.core_type<tc>} {
    %c0 = arith.constant 0 : index
    %c0_0 = arith.constant 0 : index
    %c0_1 = arith.constant 0 : index
    %0 = vector.load %arg0[%c0, %c0_0, %c0_1] : memref<2x8x32xf32, #tpu.memory_space<vmem>>, vector<2x8x32xf32>
    %c0_2 = arith.constant 0 : index
    %c0_3 = arith.constant 0 : index
    %c0_4 = arith.constant 0 : index
    %1 = vector.load %arg1[%c0_2, %c0_3, %c0_4] : memref<2x32x4xf32, #tpu.memory_space<vmem>>, vector<2x32x4xf32>
    %c0_5 = arith.constant 0 : index
    %c0_6 = arith.constant 0 : index
    %c0_7 = arith.constant 0 : index
    %2 = vector.load %arg2[%c0_5, %c0_6, %c0_7] : memref<2x32x4xf32, #tpu.memory_space<vmem>>, vector<2x32x4xf32>
    %c0_8 = arith.constant 0 : index
    %c0_9 = arith.constant 0 : index
    %c0_10 = arith.constant 0 : index
    %3 = vector.load %arg3[%c0_8, %c0_9, %c0_10] : memref<2x1x4xf32, #tpu.memory_space<vmem>>, vector<2x1x4xf32>
    %c0_11 = arith.constant 0 : index
    %c0_12 = arith.constant 0 : index
    %c0_13 = arith.constant 0 : index
    %4 = vector.load %arg4[%c0_11, %c0_12, %c0_13] : memref<2x1x4xf32, #tpu.memory_space<vmem>>, vector<2x1x4xf32>
    %c0_14 = arith.constant 0 : index
    %c0_15 = arith.constant 0 : index
    %c0_16 = arith.constant 0 : index
    %5 = vector.load %arg5[%c0_14, %c0_15, %c0_16] : memref<2x8x1xi32, #tpu.memory_space<vmem>>, vector<2x8x1xi32>
    %c0_17 = arith.constant 0 : index
    %c0_18 = arith.constant 0 : index
    %c0_19 = arith.constant 0 : index
    %c0_20 = arith.constant 0 : index
    %6 = vector.load %arg6[%c0_17, %c0_18, %c0_19, %c0_20] : memref<5x2x8x4xf32, #tpu.memory_space<vmem>>, vector<5x2x8x4xf32>
    %7 = arith.mulf %0, %0 : vector<2x8x32xf32>
    %8 = tpu.concatenate %0, %7 in 1 : vector<2x8x32xf32>, vector<2x8x32xf32> -> vector<2x16x32xf32>
    %9 = math.exp %2 : vector<2x32x4xf32>
    %10 = tpu.concatenate %1, %9 in 2 : vector<2x32x4xf32>, vector<2x32x4xf32> -> vector<2x32x8xf32>
    "tpu.trace_start"() <{level = 10 : i32, message = "eqd,edw->eqw"}> : () -> ()
    %cst = arith.constant dense<0.000000e+00> : vector<2x16x8xf32>
    %11 = tpu.matmul %8, %10, %cst {dimension_numbers = #tpu.dot_dimension_numbers<[2], [1], [1], [2], [0, 0, 0, 1, 1, 2], [0], [0]>} : vector<2x16x32xf32>, vector<2x32x8xf32>, vector<2x16x8xf32> -> vector<2x16x8xf32>
    "tpu.trace_stop"() : () -> ()
    %12 = vector.extract_strided_slice %11 {offsets = [0, 0, 0], sizes = [2, 8, 4], strides = [1, 1, 1]} : vector<2x16x8xf32> to vector<2x8x4xf32>
    %13 = vector.broadcast %3 : vector<2x1x4xf32> to vector<2x8x4xf32>
    %14 = arith.addf %12, %13 : vector<2x8x4xf32>
    %15 = vector.extract_strided_slice %11 {offsets = [0, 8, 4], sizes = [2, 8, 4], strides = [1, 1, 1]} : vector<2x16x8xf32> to vector<2x8x4xf32>
    %16 = math.exp %4 : vector<2x1x4xf32>
    %17 = vector.broadcast %16 : vector<2x1x4xf32> to vector<2x8x4xf32>
    %18 = arith.addf %15, %17 : vector<2x8x4xf32>
    %19 = vector.shape_cast %14 : vector<2x8x4xf32> to vector<1x2x8x4xf32>
    %20 = math.sqrt %18 : vector<2x8x4xf32>
    %21 = vector.shape_cast %20 : vector<2x8x4xf32> to vector<1x2x8x4xf32>
    %22 = vector.broadcast %21 : vector<1x2x8x4xf32> to vector<5x2x8x4xf32>
    %23 = arith.mulf %6, %22 : vector<5x2x8x4xf32>
    %24 = vector.broadcast %19 : vector<1x2x8x4xf32> to vector<5x2x8x4xf32>
    %25 = arith.addf %24, %23 : vector<5x2x8x4xf32>
    %cst_21 = arith.constant dense<0xFF800000> : vector<5x2x8xf32>
    %26 = vector.multi_reduction <maximumf>, %25, %cst_21 [3] : vector<5x2x8x4xf32> to vector<5x2x8xf32>
    %27 = vector.shape_cast %26 : vector<5x2x8xf32> to vector<5x2x8x1xf32>
    %cst_22 = arith.constant dense<0xFF800000> : vector<2x8x1xf32>
    %28 = vector.multi_reduction <maximumf>, %27, %cst_22 [0] : vector<5x2x8x1xf32> to vector<2x8x1xf32>
    %29 = vector.shape_cast %28 : vector<2x8x1xf32> to vector<1x2x8x1xf32>
    %30 = vector.broadcast %29 : vector<1x2x8x1xf32> to vector<5x2x8x4xf32>
    %31 = arith.subf %25, %30 : vector<5x2x8x4xf32>
    %32 = math.exp %31 : vector<5x2x8x4xf32>
    %cst_23 = arith.constant dense<0.000000e+00> : vector<2x8x4xf32>
    %33 = vector.multi_reduction <add>, %32, %cst_23 [0] : vector<5x2x8x4xf32> to vector<2x8x4xf32>
    %34 = math.log %33 : vector<2x8x4xf32>
    %35 = vector.shape_cast %29 : vector<1x2x8x1xf32> to vector<2x8x1xf32>
    %36 = vector.broadcast %35 : vector<2x8x1xf32> to vector<2x8x4xf32>
    %37 = arith.addf %34, %36 : vector<2x8x4xf32>
    %cst_24 = arith.constant 1.60943794 : f32
    %38 = vector.broadcast %cst_24 : f32 to vector<2x8x4xf32>
    %39 = arith.subf %37, %38 : vector<2x8x4xf32>
    %c0_25 = arith.constant 0 : index
    %c0_26 = arith.constant 0 : index
    %c0_27 = arith.constant 0 : index
    %40 = vector.load %arg7[%c0_25, %c0_26, %c0_27] : memref<2x8x4xf32, #tpu.memory_space<vmem>>, vector<2x8x4xf32>
    tpu.vector_store %arg7[%c0_25, %c0_26, %c0_27], %39 {strides = array<i32>} : memref<2x8x4xf32, #tpu.memory_space<vmem>>, vector<2x8x4xf32>,
    %41 = tpu.iota {dimensions = array<i32: 2>} : vector<2x8x4xi32>
    %42 = vector.broadcast %5 : vector<2x8x1xi32> to vector<2x8x4xi32>
    %43 = arith.cmpi eq, %42, %41 : vector<2x8x4xi32>
    %44 = arith.extui %43 : vector<2x8x4xi1> to vector<2x8x4xi32>
    %45 = arith.sitofp %44 : vector<2x8x4xi32> to vector<2x8x4xf32>
    %46 = vector.shape_cast %45 : vector<2x8x4xf32> to vector<1x2x8x4xf32>
    %47 = vector.broadcast %46 : vector<1x2x8x4xf32> to vector<5x2x8x4xf32>
    %48 = arith.mulf %25, %47 : vector<5x2x8x4xf32>
    %cst_28 = arith.constant dense<0.000000e+00> : vector<5x2x8xf32>
    %49 = vector.multi_reduction <add>, %48, %cst_28 [3] : vector<5x2x8x4xf32> to vector<5x2x8xf32>
    %50 = vector.shape_cast %49 : vector<5x2x8xf32> to vector<5x2x8x1xf32>
    %cst_29 = arith.constant dense<0.000000e+00> : vector<5x2x8xf32>
    %51 = vector.multi_reduction <add>, %32, %cst_29 [3] : vector<5x2x8x4xf32> to vector<5x2x8xf32>
    %52 = vector.shape_cast %51 : vector<5x2x8xf32> to vector<5x2x8x1xf32>
    %53 = math.log %52 : vector<5x2x8x1xf32>
    %54 = vector.broadcast %29 : vector<1x2x8x1xf32> to vector<5x2x8x1xf32>
    %55 = arith.addf %53, %54 : vector<5x2x8x1xf32>
    %56 = arith.subf %50, %55 : vector<5x2x8x1xf32>
    %57 = vector.extract_strided_slice %56 {offsets = [0, 0, 0, 0], sizes = [1, 1, 8, 1], strides = [1, 1, 1, 1]} : vector<5x2x8x1xf32> to vector<1x1x8x1xf32>
    %58 = vector.shape_cast %57 : vector<1x1x8x1xf32> to vector<8x1xf32>
    %59 = vector.extract_strided_slice %56 {offsets = [0, 1, 0, 0], sizes = [1, 1, 8, 1], strides = [1, 1, 1, 1]} : vector<5x2x8x1xf32> to vector<1x1x8x1xf32>
    %60 = vector.shape_cast %59 : vector<1x1x8x1xf32> to vector<8x1xf32>
    %61 = vector.extract_strided_slice %56 {offsets = [1, 0, 0, 0], sizes = [1, 1, 8, 1], strides = [1, 1, 1, 1]} : vector<5x2x8x1xf32> to vector<1x1x8x1xf32>
    %62 = vector.shape_cast %61 : vector<1x1x8x1xf32> to vector<8x1xf32>
    %63 = vector.extract_strided_slice %56 {offsets = [1, 1, 0, 0], sizes = [1, 1, 8, 1], strides = [1, 1, 1, 1]} : vector<5x2x8x1xf32> to vector<1x1x8x1xf32>
    %64 = vector.shape_cast %63 : vector<1x1x8x1xf32> to vector<8x1xf32>
    %65 = vector.extract_strided_slice %56 {offsets = [2, 0, 0, 0], sizes = [1, 1, 8, 1], strides = [1, 1, 1, 1]} : vector<5x2x8x1xf32> to vector<1x1x8x1xf32>
    %66 = vector.shape_cast %65 : vector<1x1x8x1xf32> to vector<8x1xf32>
    %67 = arith.maximumf %58, %60 : vector<8x1xf32>
    %68 = arith.maximumf %67, %62 : vector<8x1xf32>
    %69 = arith.maximumf %68, %64 : vector<8x1xf32>
    %70 = arith.maximumf %69, %66 : vector<8x1xf32>
    %cst_30 = arith.constant 0.000000e+00 : f32
    %71 = vector.broadcast %cst_30 : f32 to vector<8x1xf32>
    %72 = arith.subf %58, %70 : vector<8x1xf32>
    %73 = math.exp %72 : vector<8x1xf32>
    %74 = arith.addf %71, %73 : vector<8x1xf32>
    %75 = arith.subf %60, %70 : vector<8x1xf32>
    %76 = math.exp %75 : vector<8x1xf32>
    %77 = arith.addf %74, %76 : vector<8x1xf32>
    %78 = arith.subf %62, %70 : vector<8x1xf32>
    %79 = math.exp %78 : vector<8x1xf32>
    %80 = arith.addf %77, %79 : vector<8x1xf32>
    %81 = arith.subf %64, %70 : vector<8x1xf32>
    %82 = math.exp %81 : vector<8x1xf32>
    %83 = arith.addf %80, %82 : vector<8x1xf32>
    %84 = arith.subf %66, %70 : vector<8x1xf32>
    %85 = math.exp %84 : vector<8x1xf32>
    %86 = arith.addf %83, %85 : vector<8x1xf32>
    %87 = math.log %86 : vector<8x1xf32>
    %88 = arith.addf %87, %70 : vector<8x1xf32>
    %cst_31 = arith.constant 1.60943794 : f32
    %89 = vector.broadcast %cst_31 : f32 to vector<8x1xf32>
    %90 = arith.subf %88, %89 : vector<8x1xf32>
    %c0_32 = arith.constant 0 : index
    %c0_33 = arith.constant 0 : index
    %c0_34 = arith.constant 0 : index
    %91 = vector.load %arg8[%c0_32, %c0_33, %c0_34] : memref<2x8x1xf32, #tpu.memory_space<vmem>>, vector<1x8x1xf32>
    %92 = vector.shape_cast %91 : vector<1x8x1xf32> to vector<8x1xf32>
    %93 = vector.shape_cast %90 : vector<8x1xf32> to vector<1x8x1xf32>
    tpu.vector_store %arg8[%c0_32, %c0_33, %c0_34], %93 {strides = array<i32>} : memref<2x8x1xf32, #tpu.memory_space<vmem>>, vector<1x8x1xf32>,
    %94 = vector.extract_strided_slice %56 {offsets = [2, 1, 0, 0], sizes = [1, 1, 8, 1], strides = [1, 1, 1, 1]} : vector<5x2x8x1xf32> to vector<1x1x8x1xf32>
    %95 = vector.shape_cast %94 : vector<1x1x8x1xf32> to vector<8x1xf32>
    %96 = vector.extract_strided_slice %56 {offsets = [3, 0, 0, 0], sizes = [1, 1, 8, 1], strides = [1, 1, 1, 1]} : vector<5x2x8x1xf32> to vector<1x1x8x1xf32>
    %97 = vector.shape_cast %96 : vector<1x1x8x1xf32> to vector<8x1xf32>
    %98 = vector.extract_strided_slice %56 {offsets = [3, 1, 0, 0], sizes = [1, 1, 8, 1], strides = [1, 1, 1, 1]} : vector<5x2x8x1xf32> to vector<1x1x8x1xf32>
    %99 = vector.shape_cast %98 : vector<1x1x8x1xf32> to vector<8x1xf32>
    %100 = vector.extract_strided_slice %56 {offsets = [4, 0, 0, 0], sizes = [1, 1, 8, 1], strides = [1, 1, 1, 1]} : vector<5x2x8x1xf32> to vector<1x1x8x1xf32>
    %101 = vector.shape_cast %100 : vector<1x1x8x1xf32> to vector<8x1xf32>
    %102 = vector.extract_strided_slice %56 {offsets = [4, 1, 0, 0], sizes = [1, 1, 8, 1], strides = [1, 1, 1, 1]} : vector<5x2x8x1xf32> to vector<1x1x8x1xf32>
    %103 = vector.shape_cast %102 : vector<1x1x8x1xf32> to vector<8x1xf32>
    %104 = arith.maximumf %95, %97 : vector<8x1xf32>
    %105 = arith.maximumf %104, %99 : vector<8x1xf32>
    %106 = arith.maximumf %105, %101 : vector<8x1xf32>
    %107 = arith.maximumf %106, %103 : vector<8x1xf32>
    %cst_35 = arith.constant 0.000000e+00 : f32
    %108 = vector.broadcast %cst_35 : f32 to vector<8x1xf32>
    %109 = arith.subf %95, %107 : vector<8x1xf32>
    %110 = math.exp %109 : vector<8x1xf32>
    %111 = arith.addf %108, %110 : vector<8x1xf32>
    %112 = arith.subf %97, %107 : vector<8x1xf32>
    %113 = math.exp %112 : vector<8x1xf32>
    %114 = arith.addf %111, %113 : vector<8x1xf32>
    %115 = arith.subf %99, %107 : vector<8x1xf32>
    %116 = math.exp %115 : vector<8x1xf32>
    %117 = arith.addf %114, %116 : vector<8x1xf32>
    %118 = arith.subf %101, %107 : vector<8x1xf32>
    %119 = math.exp %118 : vector<8x1xf32>
    %120 = arith.addf %117, %119 : vector<8x1xf32>
    %121 = arith.subf %103, %107 : vector<8x1xf32>
    %122 = math.exp %121 : vector<8x1xf32>
    %123 = arith.addf %120, %122 : vector<8x1xf32>
    %124 = math.log %123 : vector<8x1xf32>
    %125 = arith.addf %124, %107 : vector<8x1xf32>
    %cst_36 = arith.constant 1.60943794 : f32
    %126 = vector.broadcast %cst_36 : f32 to vector<8x1xf32>
    %127 = arith.subf %125, %126 : vector<8x1xf32>
    %c1 = arith.constant 1 : index
    %c0_37 = arith.constant 0 : index
    %c0_38 = arith.constant 0 : index
    %128 = vector.load %arg8[%c1, %c0_37, %c0_38] : memref<2x8x1xf32, #tpu.memory_space<vmem>>, vector<1x8x1xf32>
    %129 = vector.shape_cast %128 : vector<1x8x1xf32> to vector<8x1xf32>
    %130 = vector.shape_cast %127 : vector<8x1xf32> to vector<1x8x1xf32>
    tpu.vector_store %arg8[%c1, %c0_37, %c0_38], %130 {strides = array<i32>} : memref<2x8x1xf32, #tpu.memory_space<vmem>>, vector<1x8x1xf32>,
    return
  }
}

</mosaic_0001>

<bundles_post_ra>
// kernel: versa_layer_forward.1
= control target key start
LH: loop header
LB: loop body
LE: loop exit
PB: predicated region body
PF: predicated region fallthrough
CT: control target
= control target key end

     0   :  { %vm121_vm0 = vcmask 261120   ;;  %v304_v34 = vlaneseq  ;;  %vm112_vm1 = vcmask 31744   ;;  %vm600_vm8 = vcmask 7168   ;;  %s1130_s2 = inlined_call_operand.vmem [shape: f32[2,32,4], index: 2, kind: input, shape index: {}]   ;;  %s1131_s0 = inlined_call_operand.vmem [shape: f32[2,8,32], index: 0, kind: input, shape index: {}]   ;;  %s1132_s4 = inlined_call_operand.vmem [shape: f32[2,1,4], index: 4, kind: input, shape index: {}]   ;;  %s1133_s1 = inlined_call_operand.vmem [shape: f32[2,32,4], index: 1, kind: input, shape index: {}]   ;;  %s1134_s3 = inlined_call_operand.vmem [shape: f32[2,1,4], index: 3, kind: input, shape index: {}]   ;;  %s1135_s6 = inlined_call_operand.vmem [shape: f32[5,2,8,4], index: 6, kind: input, shape index: {}]   ;;  %s1136_s5 = inlined_call_operand.vmem [shape: s32[2,8,1], index: 5, kind: input, shape index: {}]   ;;  %s1137_s7 = inlined_call_operand.vmem [shape: f32[2,8,4], index: 7, kind: output, shape index: {0}]   ;;  %s1138_s8 = inlined_call_operand.vmem [shape: f32[2,8,1], index: 8, kind: output, shape index: {1}]  }
   0x1   :  { %v38_v0 = vld [vmem:[%s1130_s2] sm:$0xff]  ;;  %v39_v1 = vld [vmem:[%s1130_s2 + $0x8] sm:$0xff]  ;;  %v40_v2 = vld [vmem:[%s1130_s2 + $0x10] sm:$0xff] }
   0x2   :  { %v64_v3 = vmul.f32 1.442695, %v38_v0  ;;  %v66_v4 = vmul.f32 1.442695, %v39_v1  ;;  %v41_v5 = vld [vmem:[%s1130_s2 + $0x18] sm:$0xff]  ;;  %v42_v6 = vld [vmem:[%s1130_s2 + $0x20] sm:$0xff] }
   0x3   :  { %v68_v7 = vmul.f32 1.442695, %v40_v2  ;;  %v70_v8 = vmul.f32 1.442695, %v41_v5  ;;  %v43_v9 = vld [vmem:[%s1130_s2 + $0x28] sm:$0xff]  ;;  %v44_v10 = vld [vmem:[%s1130_s2 + $0x30] sm:$0xff] }
   0x4   :  { %729 = vpow2.f32 %v64_v3  ;;  %v72_v11 = vmul.f32 1.442695, %v42_v6  ;;  %v45_v12 = vld [vmem:[%s1130_s2 + $0x38] sm:$0xff]  ;;  %v74_v13 = vmul.f32 1.442695, %v43_v9  ;;  %v897_v18 = vld [vmem:[%s1131_s0] sm:$0xff] }
   0x5   :  { %731 = vpow2.f32 %v66_v4  ;;  %v76_v14 = vmul.f32 1.442695, %v44_v10  ;;  %v78_v15 = vmul.f32 1.442695, %v45_v12  ;;  %673 = vmatprep.mubr.msk.f32.mxu0 %vm121_vm0, %v897_v18  ;;  %s821_s2 = smov 4   ;;  %v904_v25 = vld [vmem:[%s1131_s0 + $0x8] sm:$0xff] }
   0x6   :  { %733 = vpow2.f32 %v68_v7  ;;  %684 = vmatprep.mubr.msk.f32.mxu1 %vm121_vm0, %v904_v25  ;;  %v48_v30 = vld [vmem:[%s1132_s4] sm:$0x1]  ;;  %v49_v31 = vld [vmem:[%s1132_s4 + $0x1] sm:$0x1]  ;;  %v305_v35 = vshrl.u32 %v304_v34, 7  ;;  %v31_v43 = vld [vmem:[%s1133_s1 + $0x8] sm:$0xff]  ;;  %v63_v10 = vmul.f32 %v904_v25, %v904_v25 }
   0x7   :  { %735 = vpow2.f32 %v70_v8  ;;  %v298_v32 = vmul.f32 1.442695, %v48_v30  ;;  %v300_v33 = vmul.f32 1.442695, %v49_v31  ;;  %v30_v42 = vld [vmem:[%s1133_s1] sm:$0xff]  ;;  %v32_v47 = vld [vmem:[%s1133_s1 + $0x10] sm:$0xff]  ;;  %v62_v8 = vmul.f32 %v897_v18, %v897_v18 }
   0x8   :  { %737 = vpow2.f32 %v72_v11  ;;  %v306_v36 = vsub.s32 0, %v305_v35  ;;  %v33_v48 = vld [vmem:[%s1133_s1 + $0x18] sm:$0xff]  ;;  %v34_v55 = vld [vmem:[%s1133_s1 + $0x20] sm:$0xff]  ;;  %v35_v56 = vld [vmem:[%s1133_s1 + $0x28] sm:$0xff] }
   0x9   :  { %739 = vpow2.f32 %v74_v13  ;;  %v36_v63 = vld [vmem:[%s1133_s1 + $0x30] sm:$0xff]  ;;  %v37_v0 = vld [vmem:[%s1133_s1 + $0x38] sm:$0xff]  ;;  %s822_s1 = smov 124   ;;  %v644_v30 = vld [vmem:[%s1134_s3] ss:$0 sm:$0xff] }
   0xa   :  { %741 = vpow2.f32 %v76_v14  ;;  %v52_v31 = vld [vmem:[%s1135_s6] sm:$0xff] }
   0xb   :  { %743 = vpow2.f32 %v78_v15 }
   0xc   :  { %745 = vpow2.f32 %v298_v32  ;;  %v56_v32 = vld [vmem:[%s1135_s6 + $0x20] sm:$0xff] }
   0xd   :  { %747 = vpow2.f32 %v300_v33 }
   0xe   :  { %v730_v16 = vpop.eup %729 }
   0xf   :  { %v732_v17 = vpop.eup %731 }
  0x10   :  { %v734_v19 = vpop.eup %733  ;;  %v707_v20 = vpack.i.bf16 %v732_v17, %v730_v16 }
  0x11   :  { %v736_v21 = vpop.eup %735 }
  0x12   :  { %v738_v22 = vpop.eup %737  ;;  %708 = vrot.lane.b32.xlu0 %v707_v20, %s821_s2  ;;  %v717_v23 = vpack.i.bf16 %v736_v21, %v734_v19 }
  0x13   :  { %v740_v24 = vpop.eup %739 }
  0x14   :  { %v742_v26 = vpop.eup %741  ;;  %718 = vrot.lane.b32.xlu1 %v717_v23, %s821_s2  ;;  %v712_v27 = vpack.i.bf16 %v740_v24, %v738_v22 }
  0x15   :  { %v744_v28 = vpop.eup %743 }
  0x16   :  { %713 = vrot.lane.b32.xlu0 %v712_v27, %s821_s2  ;;  %v722_v29 = vpack.i.bf16 %v744_v28, %v742_v26  ;;  %v746_v37 = vpop.eup %745 }
  0x17   :  { %v748_v38 = vpop.eup %747  ;;  %v307_v39 = vrot.slane %v746_v37, %v306_v36 }
  0x18   :  { %723 = vrot.lane.b32.xlu1 %v722_v29, %s821_s2  ;;  %v311_v40 = vrot.slane %v748_v38, %v306_v36  ;;  %v823_v29 = vmov 0   ;;  %v54_v38 = vld [vmem:[%s1135_s6 + $0x10] sm:$0xff] }
  0x19   :  { %727 = vset.pattern.permute.xlu1 %v823_v29  ;;  %728 = vset.pattern.permute.xlu0 %v823_v29 }
  0x1a   :  { %312 = vrot.lane.b32.xlu0 %v307_v39, %s821_s2  ;;  %v645_v39 = vld [vmem:[%s1134_s3 + $0x1] ss:$0 sm:$0xff] }
  0x1c   :  { %314 = vrot.lane.b32.xlu1 %v311_v40, %s821_s2  ;;  %v53_v40 = vld [vmem:[%s1135_s6 + $0x8] sm:$0xff] }
  0x84   :  { %v709_v41 = vpop.permute.xlu0 %708 }
  0x85   :  { %v711_v44 = vunpack.i.h.bf16 %v709_v41  ;;  %v710_v45 = vunpack.i.l.bf16 %v709_v41 }
  0x86   :  { %v719_v46 = vpop.permute.xlu1 %718 }
  0x87   :  { %v721_v49 = vunpack.i.h.bf16 %v719_v46  ;;  %v720_v50 = vunpack.i.l.bf16 %v719_v46  ;;  %v113_v51 = vsel %vm112_vm1, %v30_v42, %v710_v45  ;;  %v114_v52 = vsel %vm112_vm1, %v31_v43, %v711_v44  ;;  %v57_v42 = vld [vmem:[%s1135_s6 + $0x28] sm:$0xff] }
  0x88   :  { %v714_v53 = vpop.permute.xlu0 %713  ;;  %v687_v54 = vpack.c.bf16 %v114_v52, %v113_v51  ;;  %v55_v51 = vld [vmem:[%s1135_s6 + $0x18] sm:$0xff] }
  0x89   :  { %v716_v57 = vunpack.i.h.bf16 %v714_v53  ;;  %v715_v58 = vunpack.i.l.bf16 %v714_v53  ;;  %v115_v59 = vsel %vm112_vm1, %v32_v47, %v720_v50  ;;  %v116_v60 = vsel %vm112_vm1, %v33_v48, %v721_v49  ;;  %v58_v49 = vld [vmem:[%s1135_s6 + $0x30] sm:$0xff] }
  0x8a   :  { %688 = vmatprep.subr.bf16.mxu0 %v687_v54  ;;  %v724_v61 = vpop.permute.xlu1 %723  ;;  %v691_v62 = vpack.c.bf16 %v116_v60, %v115_v59  ;;  %v60_v59 = vld [vmem:[%s1135_s6 + $0x40] sm:$0xff]  ;;  %v59_v60 = vld [vmem:[%s1135_s6 + $0x38] sm:$0xff] }
  0x8b   :  { %690 = vmatpush3.bf16.msra.mxu0 %v687_v54  ;;  %v726_v1 = vunpack.i.h.bf16 %v724_v61  ;;  %v725_v2 = vunpack.i.l.bf16 %v724_v61  ;;  %v117_v3 = vsel %vm112_vm1, %v34_v55, %v715_v58  ;;  %v118_v4 = vsel %vm112_vm1, %v35_v56, %v716_v57 }
  0x8c   :  { %692 = vmatprep.subr.bf16.mxu0 %v691_v62  ;;  %v695_v5 = vpack.c.bf16 %v118_v4, %v117_v3  ;;  %v313_v11 = vpop.permute.xlu0 %312  ;;  %v61_v3 = vld [vmem:[%s1135_s6 + $0x48] sm:$0xff] }
  0x8d   :  { %v119_v6 = vsel %vm112_vm1, %v36_v63, %v725_v2  ;;  %v120_v7 = vsel %vm112_vm1, %v37_v0, %v726_v1 }
  0x8e   :  { %696 = vmatprep.subr.bf16.mxu1 %v695_v5  ;;  %v699_v9 = vpack.c.bf16 %v120_v7, %v119_v6  ;;  %v315_v15 = vpop.permute.xlu1 %314 }
  0x8f   :  { %694 = vmatpush3.bf16.msra.mxu0 %v691_v62  ;;  %698 = vmatpush3.bf16.msra.mxu1 %v695_v5 }
  0x90   :  { %700 = vmatprep.subr.bf16.mxu1 %v699_v9 }
  0x92   :  { %674 = vmatmul.mubr.msk.f32.vlgmr.msra.gmra.mrb[0].mxu0 %vm121_vm0, %v62_v8 }
  0x93   :  { %702 = vmatpush3.bf16.msra.mxu1 %v699_v9 }
  0x96   :  { %685 = vmatmul.mubr.msk.f32.vlgmr.msra.gmra.mrb[0].mxu1 %vm121_vm0, %v63_v10 }
 0x165   :  { %v675_v12 = vpop.f32.mrb[0].mxu0 }
 0x166   :  { %v318_v13 = vadd.f32 %v675_v12, %v313_v11  ;;  %v194_v14 = vpop.f32.mrb[1].mxu0 }
 0x167   :  { %v296_v35 = vadd.f32 %v644_v30, %v194_v14  ;;  %v51_v14 = vld [vmem:[%s1136_s5 + $0x8] sm:$0xff] }
 0x168   :  { %749 = vrsqrt.f32 %v318_v13  ;;  %vm322_vm2 = vcmp.eq.f32.partialorder %v318_v13, inf  ;;  %v325_v21 = vand.u32 2147483648, %v318_v13  ;;  %vm324_vm3 = vcmp.eq.f32.partialorder %v318_v13, 0.0 }
 0x169   :  { %v686_v16 = vpop.f32.mrb[0].mxu1 }
 0x16a   :  { %v319_v17 = vadd.f32 %v686_v16, %v315_v15  ;;  %v275_v18 = vpop.f32.mrb[1].mxu1 }
 0x16b   :  { %v297_v45 = vadd.f32 %v645_v39, %v275_v18 }
 0x16c   :  { %751 = vrsqrt.f32 %v319_v17  ;;  %vm329_vm4 = vcmp.eq.f32.partialorder %v319_v17, inf  ;;  %v332_v26 = vand.u32 2147483648, %v319_v17  ;;  %vm331_vm5 = vcmp.eq.f32.partialorder %v319_v17, 0.0 }
 0x172   :  { %v750_v19 = vpop.eup %749 }
 0x173   :  { %v321_v20 = vmul.f32 %v750_v19, %v318_v13 }
 0x175   :  { %v323_v22 = vsel %vm322_vm2, %v318_v13, %v321_v20  ;;  %v50_v13 = vld [vmem:[%s1136_s5] sm:$0xff] }
 0x176   :  { %v752_v23 = vpop.eup %751  ;;  %v326_v24 = vsel %vm324_vm3, %v325_v21, %v323_v22 }
 0x177   :  { %336 = vrot.lane.b32.xlu0 %v326_v24, %s822_s1  ;;  %v328_v25 = vmul.f32 %v752_v23, %v319_v17 }
 0x179   :  { %v330_v27 = vsel %vm329_vm4, %v319_v17, %v328_v25 }
 0x17a   :  { %v333_v28 = vsel %vm331_vm5, %v332_v26, %v330_v27  ;;  %v459_v27 = vand.u32 127, %v304_v34 }
 0x17b   :  { %338 = vrot.lane.b32.xlu1 %v333_v28, %s822_s1 }
 0x1e9   :  { %v337_v33 = vpop.permute.xlu0 %336 }
 0x1ea   :  { %v342_v36 = vmul.f32 %v337_v33, %v52_v31  ;;  %v346_v37 = vmul.f32 %v337_v33, %v56_v32  ;;  %v344_v44 = vmul.f32 %v337_v33, %v54_v38  ;;  %v348_v54 = vmul.f32 %v337_v33, %v58_v49 }
 0x1eb   :  { %v350_v62 = vmul.f32 %v337_v33, %v60_v59 }
 0x1ec   :  { %v971_v41 = vadd.f32 %v342_v36, %v296_v35  ;;  %v978_v48 = vadd.f32 %v346_v37, %v296_v35  ;;  %v988_v53 = vadd.f32 %v344_v44, %v296_v35  ;;  %v1002_v61 = vadd.f32 %v348_v54, %v296_v35 }
 0x1ed   :  { %v339_v43 = vpop.permute.xlu1 %338  ;;  %v1013_v4 = vadd.f32 %v350_v62, %v296_v35  ;;  %v824_v36 = vmov 0.0  }
 0x1ee   :  { %v362_v46 = vsel %vm112_vm1, %v971_v41, -inf  ;;  %v343_v47 = vmul.f32 %v339_v43, %v53_v40  ;;  %v347_v50 = vmul.f32 %v339_v43, %v57_v42  ;;  %v374_v56 = vsel %vm112_vm1, %v978_v48, -inf }
 0x1ef   :  { %363 = vmax.xlane.f32.xlu0 %v362_v46  ;;  %v345_v58 = vmul.f32 %v339_v43, %v55_v51  ;;  %v368_v63 = vsel %vm112_vm1, %v988_v53, -inf  ;;  %v349_v2 = vmul.f32 %v339_v43, %v59_v60  ;;  %v380_v5 = vsel %vm112_vm1, %v1002_v61, -inf }
 0x1f0   :  { %v986_v52 = vadd.f32 %v343_v47, %v297_v45  ;;  %v994_v57 = vadd.f32 %v347_v50, %v297_v45  ;;  %v351_v8 = vmul.f32 %v339_v43, %v61_v3  ;;  %v386_v9 = vsel %vm112_vm1, %v1013_v4, -inf }
 0x1f1   :  { %v1008_v1 = vadd.f32 %v345_v58, %v297_v45  ;;  %v1019_v7 = vadd.f32 %v349_v2, %v297_v45 }
 0x1f2   :  { %v365_v55 = vsel %vm112_vm1, %v986_v52, -inf  ;;  %v377_v0 = vsel %vm112_vm1, %v994_v57, -inf  ;;  %v1025_v11 = vadd.f32 %v351_v8, %v297_v45 }
 0x1f3   :  { %366 = vmax.xlane.f32.xlu1 %v365_v55  ;;  %375 = vmax.xlane.f32.xlu0 %v374_v56  ;;  %v371_v6 = vsel %vm112_vm1, %v1008_v1, -inf  ;;  %v383_v10 = vsel %vm112_vm1, %v1019_v7, -inf }
 0x1f4   :  { %v389_v12 = vsel %vm112_vm1, %v1025_v11, -inf }
 0x1f7   :  { %369 = vmax.xlane.f32.xlu1 %v368_v63  ;;  %378 = vmax.xlane.f32.xlu0 %v377_v0 }
 0x1fb   :  { %381 = vmax.xlane.f32.xlu1 %v380_v5  ;;  %372 = vmax.xlane.f32.xlu0 %v371_v6 }
 0x1ff   :  { %387 = vmax.xlane.f32.xlu1 %v386_v9  ;;  %384 = vmax.xlane.f32.xlu0 %v383_v10 }
 0x203   :  { %390 = vmax.xlane.f32.xlu0 %v389_v12 }
 0x210   :  { %461 = vperm.xlu1 %727, %v50_v13  }
 0x219   :  { %464 = vperm.xlu0 %728, %v51_v14  }
 0x27c   :  { %v364_v15 = vpop.xlane.xlu0 %363 }
 0x280   :  { %v367_v16 = vpop.xlane.xlu1 %366  ;;  %v376_v17 = vpop.xlane.xlu0 %375 }
 0x281   :  { %v392_v22 = vmax.f32 %v364_v15, %v376_v17 }
 0x284   :  { %v370_v18 = vpop.xlane.xlu1 %369  ;;  %v379_v19 = vpop.xlane.xlu0 %378 }
 0x285   :  { %v396_v28 = vmax.f32 %v367_v16, %v379_v19 }
 0x288   :  { %v382_v20 = vpop.xlane.xlu1 %381  ;;  %v373_v21 = vpop.xlane.xlu0 %372 }
 0x289   :  { %v393_v25 = vmax.f32 %v370_v18, %v382_v20 }
 0x28c   :  { %v388_v23 = vpop.xlane.xlu1 %387  ;;  %v385_v24 = vpop.xlane.xlu0 %384 }
 0x28d   :  { %v394_v26 = vmax.f32 %v392_v22, %v388_v23  ;;  %v397_v32 = vmax.f32 %v373_v21, %v385_v24 }
 0x28f   :  { %v1036_v29 = vmax.f32 %v394_v26, %v393_v25 }
 0x290   :  { %v462_v30 = vpop.permute.xlu1 %461  ;;  %v391_v31 = vpop.xlane.xlu0 %390 }
 0x291   :  { %vm466_vm6 = vcmp.eq.s32.totalorder %v462_v30, %v459_v27  ;;  %v398_v33 = vmax.f32 %v396_v28, %v391_v31  ;;  %v400_v35 = vsub.f32 %v971_v41, %v1036_v29  ;;  %v406_v38 = vsub.f32 %v1002_v61, %v1036_v29 }
 0x292   :  { %v1040_v37 = vsel %vm466_vm6, 1.0, %v824_v36  ;;  %v402_v34 = vsub.f32 %v988_v53, %v1036_v29  ;;  %v408_v44 = vsub.f32 %v1013_v4, %v1036_v29 }
 0x293   :  { %v1046_v39 = vmax.f32 %v398_v33, %v397_v32  ;;  %v472_v40 = vmul.f32 %v1040_v37, %v971_v41  ;;  %v410_v42 = vmul.f32 1.442695, %v400_v35  ;;  %v422_v49 = vmul.f32 1.442695, %v406_v38 }
 0x294   :  { %v414_v43 = vmul.f32 1.442695, %v402_v34  ;;  %v404_v41 = vsub.f32 %v978_v48, %v1036_v29  ;;  %v426_v58 = vmul.f32 1.442695, %v408_v44  ;;  %v478_v32 = vmul.f32 %v1040_v37, %v1002_v61 }
 0x295   :  { %v482_v45 = vsel %vm112_vm1, %v472_v40, 0.0  ;;  %753 = vpow2.f32 %v410_v42  ;;  %v405_v46 = vsub.f32 %v994_v57, %v1046_v39  ;;  %v401_v47 = vsub.f32 %v986_v52, %v1046_v39 }
 0x296   :  { %483 = vadd.xlane.f32.xlu1 %v482_v45  ;;  %v407_v50 = vsub.f32 %v1019_v7, %v1046_v39  ;;  %755 = vpow2.f32 %v414_v43  ;;  %v403_v55 = vsub.f32 %v1008_v1, %v1046_v39  ;;  %v409_v56 = vsub.f32 %v1025_v11, %v1046_v39 }
 0x297   :  { %v420_v51 = vmul.f32 1.442695, %v405_v46  ;;  %v412_v54 = vmul.f32 1.442695, %v401_v47  ;;  %v418_v60 = vmul.f32 1.442695, %v404_v41  ;;  %v480_v61 = vmul.f32 %v1040_v37, %v1013_v4 }
 0x298   :  { %v416_v59 = vmul.f32 1.442695, %v403_v55  ;;  %v424_v62 = vmul.f32 1.442695, %v407_v50  ;;  %v465_v63 = vpop.permute.xlu0 %464  ;;  %v428_v0 = vmul.f32 1.442695, %v409_v56  ;;  %v474_v55 = vmul.f32 %v1040_v37, %v988_v53 }
 0x299   :  { %757 = vpow2.f32 %v420_v51  ;;  %vm467_vm7 = vcmp.eq.s32.totalorder %v465_v63, %v459_v27  ;;  %v500_v34 = vsel %vm112_vm1, %v478_v32, 0.0  ;;  %v506_v43 = vsel %vm112_vm1, %v480_v61, 0.0 }
 0x29a   :  { %759 = vpow2.f32 %v412_v54  ;;  %v1066_v6 = vsel %vm467_vm7, 1.0, %v824_v36  ;;  %v476_v53 = vmul.f32 %v1040_v37, %v978_v48 }
 0x29b   :  { %761 = vpow2.f32 %v422_v49  ;;  %v473_v15 = vmul.f32 %v1066_v6, %v986_v52  ;;  %v479_v40 = vmul.f32 %v1066_v6, %v1019_v7  ;;  %v481_v44 = vmul.f32 %v1066_v6, %v1025_v11 }
 0x29c   :  { %763 = vpow2.f32 %v426_v58  ;;  %v477_v7 = vmul.f32 %v1066_v6, %v994_v57  ;;  %v488_v57 = vsel %vm112_vm1, %v474_v55, 0.0  ;;  %v475_v56 = vmul.f32 %v1066_v6, %v1008_v1 }
 0x29d   :  { %765 = vpow2.f32 %v416_v59  ;;  %v485_v23 = vsel %vm112_vm1, %v473_v15, 0.0  ;;  %v503_v42 = vsel %vm112_vm1, %v479_v40, 0.0  ;;  %v509_v4 = vsel %vm112_vm1, %v481_v44, 0.0 }
 0x29e   :  { %767 = vpow2.f32 %v418_v60  ;;  %v497_v11 = vsel %vm112_vm1, %v477_v7, 0.0  ;;  %v491_v58 = vsel %vm112_vm1, %v475_v56, 0.0  ;;  %v494_v59 = vsel %vm112_vm1, %v476_v53, 0.0 }
 0x29f   :  { %v754_v2 = vpop.eup %753  ;;  %769 = vpow2.f32 %v424_v62 }
 0x2a0   :  { %v430_v3 = vsel %vm112_vm1, %v754_v2, 0.0  ;;  %771 = vpow2.f32 %v428_v0  ;;  %v756_v5 = vpop.eup %755 }
 0x2a1   :  { %512 = vadd.xlane.f32.xlu1 %v430_v3  ;;  %v431_v9 = vsel %vm112_vm1, %v756_v5, 0.0 }
 0x2a2   :  { %v432_v17 = vadd.f32 %v431_v9, %v430_v3 }
 0x2a3   :  { %v758_v8 = vpop.eup %757 }
 0x2a4   :  { %v760_v10 = vpop.eup %759  ;;  %v442_v12 = vsel %vm112_vm1, %v758_v8, 0.0 }
 0x2a5   :  { %v762_v13 = vpop.eup %761  ;;  %522 = vadd.xlane.f32.xlu1 %v442_v12  ;;  %v439_v14 = vsel %vm112_vm1, %v760_v10, 0.0 }
 0x2a6   :  { %v764_v16 = vpop.eup %763  ;;  %514 = vadd.xlane.f32.xlu0 %v439_v14  ;;  %v435_v20 = vsel %vm112_vm1, %v762_v13, 0.0 }
 0x2a7   :  { %v766_v18 = vpop.eup %765  ;;  %v437_v35 = vsel %vm112_vm1, %v764_v16, 0.0 }
 0x2a8   :  { %v768_v19 = vpop.eup %767  ;;  %v440_v21 = vsel %vm112_vm1, %v766_v18, 0.0 }
 0x2a9   :  { %v770_v22 = vpop.eup %769  ;;  %524 = vadd.xlane.f32.xlu1 %v435_v20  ;;  %v441_v24 = vadd.f32 %v440_v21, %v439_v14  ;;  %v433_v25 = vsel %vm112_vm1, %v768_v19, 0.0 }
 0x2aa   :  { %v772_v26 = vpop.eup %771  ;;  %486 = vadd.xlane.f32.xlu0 %v485_v23  ;;  %v434_v27 = vadd.f32 %v433_v25, %v432_v17  ;;  %v444_v28 = vsel %vm112_vm1, %v770_v22, 0.0 }
 0x2ab   :  { %v443_v52 = vadd.f32 %v442_v12, %v441_v24  ;;  %v446_v31 = vsel %vm112_vm1, %v772_v26, 0.0 }
 0x2ac   :  { %v436_v30 = vadd.f32 %v435_v20, %v434_v27 }
 0x2ad   :  { %516 = vadd.xlane.f32.xlu1 %v431_v9  ;;  %v445_v33 = vadd.f32 %v444_v28, %v443_v52 }
 0x2ae   :  { %530 = vadd.xlane.f32.xlu0 %v446_v31  ;;  %v438_v36 = vadd.f32 %v437_v35, %v436_v30 }
 0x2af   :  { %v447_v38 = vadd.f32 %v446_v31, %v445_v33 }
 0x2b0   :  { %773 = vlog2.f32 %v438_v36 }
 0x2b1   :  { %526 = vadd.xlane.f32.xlu1 %v444_v28  ;;  %775 = vlog2.f32 %v447_v38 }
 0x2b2   :  { %501 = vadd.xlane.f32.xlu0 %v500_v34 }
 0x2b5   :  { %518 = vadd.xlane.f32.xlu1 %v440_v21 }
 0x2b6   :  { %504 = vadd.xlane.f32.xlu0 %v503_v42 }
 0x2b9   :  { %528 = vadd.xlane.f32.xlu1 %v437_v35 }
 0x2ba   :  { %v774_v45 = vpop.eup %773  ;;  %507 = vadd.xlane.f32.xlu0 %v506_v43 }
 0x2bb   :  { %v776_v46 = vpop.eup %775  ;;  %v449_v47 = vmul.f32 0.6931472, %v774_v45 }
 0x2bc   :  { %v451_v49 = vmul.f32 0.6931472, %v776_v46 }
 0x2bd   :  { %v452_v50 = vadd.f32 %v449_v47, %v1036_v29  ;;  %520 = vadd.xlane.f32.xlu1 %v433_v25 }
 0x2be   :  { %v453_v41 = vadd.f32 %v451_v49, %v1046_v39  ;;  %510 = vadd.xlane.f32.xlu0 %v509_v4 }
 0x2bf   :  { %v646_v51 = vadd.f32 -1.609438, %v452_v50 }
 0x2c0   :  { %v647_v54 = vadd.f32 -1.609438, %v453_v41 }
 0x2c1   :  { %456 = vst.msk [vmem:[%s1137_s7] sm:$0xff] %vm112_vm1, %v646_v51  ;;  %498 = vadd.xlane.f32.xlu1 %v497_v11 }
 0x2c2   :  { %457 = vst.msk [vmem:[%s1137_s7 + $0x8] sm:$0xff] %vm112_vm1, %v647_v54 }
 0x2c5   :  { %489 = vadd.xlane.f32.xlu1 %v488_v57 }
 0x2c9   :  { %492 = vadd.xlane.f32.xlu1 %v491_v58 }
 0x2cd   :  { %495 = vadd.xlane.f32.xlu1 %v494_v59 }
 0x323   :  { %v484_v60 = vpop.xlane.xlu1 %483 }
 0x32e   :  { %v513_v62 = vpop.xlane.xlu1 %512 }
 0x332   :  { %v523_v63 = vpop.xlane.xlu1 %522 }
 0x333   :  { %v515_v0 = vpop.xlane.xlu0 %514 }
 0x336   :  { %v525_v2 = vpop.xlane.xlu1 %524 }
 0x337   :  { %v487_v3 = vpop.xlane.xlu0 %486  ;;  %777 = vlog2.f32 %v525_v2 }
 0x338   :  { %779 = vlog2.f32 %v523_v63 }
 0x339   :  { %781 = vlog2.f32 %v515_v0 }
 0x33a   :  { %v517_v5 = vpop.xlane.xlu1 %516 }
 0x33b   :  { %v531_v1 = vpop.xlane.xlu0 %530 }
 0x33e   :  { %v527_v6 = vpop.xlane.xlu1 %526 }
 0x33f   :  { %783 = vlog2.f32 %v527_v6  ;;  %v502_v37 = vpop.xlane.xlu0 %501 }
 0x340   :  { %785 = vlog2.f32 %v513_v62 }
 0x341   :  { %787 = vlog2.f32 %v517_v5  ;;  %v778_v8 = vpop.eup %777 }
 0x342   :  { %v519_v48 = vpop.xlane.xlu1 %518  ;;  %789 = vlog2.f32 %v531_v1  ;;  %v780_v9 = vpop.eup %779  ;;  %v545_v13 = vmul.f32 0.6931472, %v778_v8 }
 0x343   :  { %791 = vlog2.f32 %v519_v48  ;;  %v782_v12 = vpop.eup %781  ;;  %v543_v15 = vmul.f32 0.6931472, %v780_v9  ;;  %v505_v16 = vpop.xlane.xlu0 %504 }
 0x344   :  { %v535_v19 = vmul.f32 0.6931472, %v782_v12  ;;  %v558_v22 = vadd.f32 %v545_v13, %v1036_v29 }
 0x345   :  { %v557_v25 = vadd.f32 %v543_v15, %v1046_v39 }
 0x346   :  { %v529_v10 = vpop.xlane.xlu1 %528  ;;  %v553_v52 = vadd.f32 %v535_v19, %v1046_v39  ;;  %v568_v33 = vsub.f32 %v502_v37, %v558_v22 }
 0x347   :  { %793 = vlog2.f32 %v529_v10  ;;  %v508_v30 = vpop.xlane.xlu0 %507 }
 0x348   :  { %v563_v43 = vsub.f32 %v487_v3, %v553_v52 }
 0x349   :  { %v784_v14 = vpop.eup %783 }
 0x34a   :  { %v786_v17 = vpop.eup %785  ;;  %v521_v18 = vpop.xlane.xlu1 %520  ;;  %v547_v21 = vmul.f32 0.6931472, %v784_v14 }
 0x34b   :  { %795 = vlog2.f32 %v521_v18  ;;  %v788_v20 = vpop.eup %787  ;;  %v533_v24 = vmul.f32 0.6931472, %v786_v17  ;;  %v511_v50 = vpop.xlane.xlu0 %510 }
 0x34c   :  { %v790_v23 = vpop.eup %789  ;;  %v537_v28 = vmul.f32 0.6931472, %v788_v20  ;;  %v559_v35 = vadd.f32 %v547_v21, %v1046_v39 }
 0x34d   :  { %v792_v26 = vpop.eup %791  ;;  %v551_v32 = vmul.f32 0.6931472, %v790_v23  ;;  %v552_v38 = vadd.f32 %v533_v24, %v1036_v29 }
 0x34e   :  { %v499_v27 = vpop.xlane.xlu1 %498  ;;  %v539_v34 = vmul.f32 0.6931472, %v792_v26  ;;  %v554_v44 = vadd.f32 %v537_v28, %v1036_v29  ;;  %v569_v45 = vsub.f32 %v505_v16, %v559_v35 }
 0x34f   :  { %v567_v31 = vsub.f32 %v499_v27, %v557_v25  ;;  %v561_v47 = vadd.f32 %v551_v32, %v1046_v39  ;;  %v562_v7 = vsub.f32 %v484_v60, %v552_v38 }
 0x350   :  { %v555_v41 = vadd.f32 %v539_v34, %v1046_v39 }
 0x351   :  { %v794_v36 = vpop.eup %793  ;;  %v602_v42 = vmax.f32 %v567_v31, %v568_v33  ;;  %v572_v57 = vmax.f32 %v562_v7, %v563_v43  ;;  %v571_v58 = vsub.f32 %v511_v50, %v561_v47 }
 0x352   :  { %v549_v40 = vmul.f32 0.6931472, %v794_v36  ;;  %v490_v61 = vpop.xlane.xlu1 %489 }
 0x353   :  { %v564_v4 = vsub.f32 %v490_v61, %v554_v44  ;;  %v603_v11 = vmax.f32 %v602_v42, %v569_v45 }
 0x354   :  { %v560_v46 = vadd.f32 %v549_v40, %v1036_v29 }
 0x355   :  { %v796_v49 = vpop.eup %795  ;;  %v573_v62 = vmax.f32 %v572_v57, %v564_v4 }
 0x356   :  { %v570_v51 = vsub.f32 %v508_v30, %v560_v46  ;;  %v541_v54 = vmul.f32 0.6931472, %v796_v49  ;;  %v493_v55 = vpop.xlane.xlu1 %492 }
 0x357   :  { %v565_v56 = vsub.f32 %v493_v55, %v555_v41 }
 0x358   :  { %v604_v53 = vmax.f32 %v603_v11, %v570_v51  ;;  %v556_v59 = vadd.f32 %v541_v54, %v1036_v29 }
 0x359   :  { %v574_v2 = vmax.f32 %v573_v62, %v565_v56 }
 0x35a   :  { %v605_v63 = vmax.f32 %v604_v53, %v571_v58  ;;  %v496_v0 = vpop.xlane.xlu1 %495 }
 0x35b   :  { %v566_v3 = vsub.f32 %v496_v0, %v556_v59 }
 0x35c   :  { %v606_v60 = vsub.f32 %v567_v31, %v605_v63  ;;  %v610_v5 = vsub.f32 %v568_v33, %v605_v63  ;;  %v614_v1 = vsub.f32 %v569_v45, %v605_v63  ;;  %v618_v6 = vsub.f32 %v570_v51, %v605_v63 }
 0x35d   :  { %v575_v39 = vmax.f32 %v574_v2, %v566_v3  ;;  %v622_v9 = vsub.f32 %v571_v58, %v605_v63 }
 0x35e   :  { %v607_v48 = vmul.f32 1.442695, %v606_v60  ;;  %v611_v37 = vmul.f32 1.442695, %v610_v5  ;;  %v615_v8 = vmul.f32 1.442695, %v614_v1 }
 0x35f   :  { %v576_v10 = vsub.f32 %v562_v7, %v575_v39  ;;  %v580_v12 = vsub.f32 %v563_v43, %v575_v39  ;;  %v619_v13 = vmul.f32 1.442695, %v618_v6  ;;  %v584_v14 = vsub.f32 %v564_v4, %v575_v39 }
 0x360   :  { %797 = vpow2.f32 %v607_v48  ;;  %v588_v16 = vsub.f32 %v565_v56, %v575_v39  ;;  %v623_v17 = vmul.f32 1.442695, %v622_v9  ;;  %v592_v19 = vsub.f32 %v566_v3, %v575_v39 }
 0x361   :  { %799 = vpow2.f32 %v611_v37  ;;  %v577_v29 = vmul.f32 1.442695, %v576_v10  ;;  %v581_v15 = vmul.f32 1.442695, %v580_v12  ;;  %v585_v18 = vmul.f32 1.442695, %v584_v14 }
 0x362   :  { %801 = vpow2.f32 %v615_v8  ;;  %v589_v20 = vmul.f32 1.442695, %v588_v16  ;;  %v593_v21 = vmul.f32 1.442695, %v592_v19 }
 0x363   :  { %803 = vpow2.f32 %v619_v13 }
 0x364   :  { %805 = vpow2.f32 %v577_v29 }
 0x365   :  { %807 = vpow2.f32 %v581_v15 }
 0x366   :  { %809 = vpow2.f32 %v623_v17 }
 0x367   :  { %811 = vpow2.f32 %v585_v18 }
 0x368   :  { %813 = vpow2.f32 %v589_v20 }
 0x369   :  { %815 = vpow2.f32 %v593_v21 }
 0x36a   :  { %v798_v22 = vpop.eup %797 }
 0x36b   :  { %v800_v23 = vpop.eup %799 }
 0x36c   :  { %v613_v24 = vadd.f32 %v800_v23, %v798_v22  ;;  %v802_v25 = vpop.eup %801 }
 0x36d   :  { %v804_v26 = vpop.eup %803 }
 0x36e   :  { %v617_v27 = vadd.f32 %v802_v25, %v613_v24  ;;  %v806_v52 = vpop.eup %805 }
 0x36f   :  { %v808_v28 = vpop.eup %807 }
 0x370   :  { %v621_v30 = vadd.f32 %v804_v26, %v617_v27  ;;  %v810_v31 = vpop.eup %809  ;;  %v583_v32 = vadd.f32 %v808_v28, %v806_v52 }
 0x371   :  { %v812_v33 = vpop.eup %811 }
 0x372   :  { %v625_v35 = vadd.f32 %v810_v31, %v621_v30  ;;  %v587_v36 = vadd.f32 %v812_v33, %v583_v32  ;;  %v814_v38 = vpop.eup %813 }
 0x373   :  { %v816_v40 = vpop.eup %815 }
 0x374   :  { %817 = vlog2.f32 %v625_v35  ;;  %v591_v34 = vadd.f32 %v814_v38, %v587_v36 }
 0x376   :  { %v595_v42 = vadd.f32 %v816_v40, %v591_v34 }
 0x378   :  { %819 = vlog2.f32 %v595_v42 }
 0x37e   :  { %v818_v61 = vpop.eup %817 }
 0x37f   :  { %v627_v43 = vmul.f32 0.6931472, %v818_v61 }
 0x381   :  { %v628_v44 = vadd.f32 %v627_v43, %v605_v63 }
 0x382   :  { %v820_v45 = vpop.eup %819 }
 0x383   :  { %v651_v46 = vadd.f32 -1.609438, %v628_v44  ;;  %v597_v47 = vmul.f32 0.6931472, %v820_v45 }
 0x385   :  { %652 = vst.msk [vmem:[%s1138_s8 + $0x8] sm:$0xff] %vm600_vm8, %v651_v46  ;;  %v598_v49 = vadd.f32 %v597_v47, %v575_v39 }
 0x387   :  { %v650_v7 = vadd.f32 -1.609438, %v598_v49 }
 0x389   :  { %601 = vst.msk [vmem:[%s1138_s8] sm:$0xff] %vm600_vm8, %v650_v7 }

</bundles_post_ra>
